<compile_context>
chip_gen: v7x
topology: tpu7x:2x2x1
jax: 0.10.0
libtpu: 0.0.40
codegen_flags: <defaults>
</compile_context>

<pallas_src>
import functools

import jax
import jax.numpy as jnp
from jax.experimental import pallas as pl
from jax.experimental.pallas import tpu as pltpu

_LANE = 128     # vreg lane width (fast axis)
_SUBLANE = 8    # f32 sublane count


def _normalize_kernel(mean_ref, inv_std_ref, x_ref, o_ref):
    # mean_ref / inv_std_ref: full (C,) vectors in SMEM (scalar reads).
    # x_ref / o_ref:          (1, C, tile_rows, 128) lane-dense VMEM tiles.
    C = x_ref.shape[1]
    for c in range(C):  # static unroll over channels (C is tiny)
        o_ref[0, c] = (x_ref[0, c] - mean_ref[c]) * inv_std_ref[c]


@functools.partial(jax.jit, static_argnames=("target_block_bytes",))
def normalize(x: jax.Array, mean: jax.Array, std: jax.Array,
              *, target_block_bytes: int = 2 * 1024 * 1024) -> jax.Array:
    """y = (x - mean[c]) / std[c] for NCHW x; mean, std are (C,) vectors."""
    N, C, H, W = x.shape
    assert mean.shape == (C,) and std.shape == (C,)
    dtype = x.dtype
    itemsize = dtype.itemsize

    # ---- lane-dense re-layout: flatten HxW, pad to (rows_padded, 128) ----
    L = H * W
    rows = pl.cdiv(L, _LANE)                      # 128-wide rows per (n, c)
    bytes_per_row = C * _LANE * itemsize          # one sublane-row across all C
    max_tile_rows = max(
        _SUBLANE,
        (target_block_bytes // bytes_per_row) // _SUBLANE * _SUBLANE,
    )
    tile_rows = min(max_tile_rows, pl.cdiv(rows, _SUBLANE) * _SUBLANE)
    rows_padded = pl.cdiv(rows, tile_rows) * tile_rows
    L_pad = rows_padded * _LANE

    x_flat = x.reshape(N, C, L)
    if L_pad != L:
        x_flat = jnp.pad(x_flat, ((0, 0), (0, 0), (0, L_pad - L)))
    x_tiled = x_flat.reshape(N, C, rows_padded, _LANE)

    # ---- precompute per-channel affine params (divide -> multiply) ----
    mean_c = mean.astype(dtype)
    inv_std_c = (1.0 / std.astype(jnp.float32)).astype(dtype)

    num_tiles = rows_padded // tile_rows
    grid = (N, num_tiles)

    out_tiled = pl.pallas_call(
        _normalize_kernel,
        out_shape=jax.ShapeDtypeStruct((N, C, rows_padded, _LANE), dtype),
        grid=grid,
        in_specs=[
            pl.BlockSpec(memory_space=pltpu.SMEM),   # mean, full (C,) in SMEM
            pl.BlockSpec(memory_space=pltpu.SMEM),   # 1/std, full (C,) in SMEM
            pl.BlockSpec((1, C, tile_rows, _LANE), lambda n, s: (n, 0, s, 0)),
        ],
        out_specs=pl.BlockSpec((1, C, tile_rows, _LANE), lambda n, s: (n, 0, s, 0)),
        compiler_params=pltpu.CompilerParams(
            dimension_semantics=("parallel", "parallel"),
        ),
    )(mean_c, inv_std_c, x_tiled)

    # ---- drop padding and restore NCHW ----
    out = out_tiled.reshape(N, C, L_pad)[:, :, :L].reshape(N, C, H, W)
    return out


if __name__ == "__main__":
    # Deterministic parameters, as in the PyTorch module defaults.
    mean = jnp.asarray([0.485, 0.456, 0.406], dtype=jnp.float32)
    std = jnp.asarray([0.229, 0.224, 0.225], dtype=jnp.float32)

    # Small NCHW input consistent with a 3-channel image tensor.
    key = jax.random.PRNGKey(0)
    x = jax.random.uniform(key, (2, 3, 16, 16), dtype=jnp.float32)

    out = jax.block_until_ready(normalize(x, mean, std))

    # Reference check in plain JAX (same math as tensor.sub_(mean).div_(std)).
    # Tolerance covers the exact-divide vs. multiply-by-reciprocal ulp delta.
    ref = (x - mean[None, :, None, None]) / std[None, :, None, None]
    assert out.shape == x.shape and out.dtype == x.dtype
    assert jnp.allclose(out, ref, atol=1e-5, rtol=1e-5), "mismatch vs reference"

    print("KERNEL_OK")
</pallas_src>

<mosaic_0001>
module attributes {stable_mosaic.version = 11 : i64} {
  func.func @_normalize_kernel(%arg0: i32, %arg1: i32, %arg2: memref<3xf32, #tpu.memory_space<smem>>, %arg3: memref<3xf32, #tpu.memory_space<smem>>, %arg4: memref<1x3x8x128xf32, #tpu.memory_space<vmem>>, %arg5: memref<1x3x8x128xf32, #tpu.memory_space<vmem>>) attributes {dimension_semantics = [#tpu.dimension_semantics<parallel>, #tpu.dimension_semantics<parallel>], iteration_bounds = array<i64: 2, 1>, scalar_prefetch = 0 : i64, scratch_operands = 0 : i64, tpu.core_type = #tpu.core_type<tc>, window_params = [{transform_indices = @transform_0, window_bounds = array<i64: 3>}, {transform_indices = @transform_1, window_bounds = array<i64: 3>}, {transform_indices = @transform_2, window_bounds = array<i64: 1, 3, 8, 128>}, {transform_indices = @transform_3, window_bounds = array<i64: 1, 3, 8, 128>}]} {
    %c0 = arith.constant 0 : index
    %c0_0 = arith.constant 0 : index
    %c0_1 = arith.constant 0 : index
    %c0_2 = arith.constant 0 : index
    %0 = vector.load %arg4[%c0, %c0_0, %c0_1, %c0_2] : memref<1x3x8x128xf32, #tpu.memory_space<vmem>>, vector<1x1x8x128xf32>
    %1 = vector.shape_cast %0 : vector<1x1x8x128xf32> to vector<8x128xf32>
    %c0_3 = arith.constant 0 : index
    %2 = memref.load %arg2[%c0_3] : memref<3xf32, #tpu.memory_space<smem>>
    %3 = vector.broadcast %2 : f32 to vector<8x128xf32>
    %4 = arith.subf %1, %3 : vector<8x128xf32>
    %c0_4 = arith.constant 0 : index
    %5 = memref.load %arg3[%c0_4] : memref<3xf32, #tpu.memory_space<smem>>
    %6 = vector.broadcast %5 : f32 to vector<8x128xf32>
    %7 = arith.mulf %4, %6 : vector<8x128xf32>
    %c0_5 = arith.constant 0 : index
    %c0_6 = arith.constant 0 : index
    %c0_7 = arith.constant 0 : index
    %c0_8 = arith.constant 0 : index
    %8 = vector.load %arg5[%c0_5, %c0_6, %c0_7, %c0_8] : memref<1x3x8x128xf32, #tpu.memory_space<vmem>>, vector<1x1x8x128xf32>
    %9 = vector.shape_cast %8 : vector<1x1x8x128xf32> to vector<8x128xf32>
    %10 = vector.shape_cast %7 : vector<8x128xf32> to vector<1x1x8x128xf32>
    tpu.vector_store %arg5[%c0_5, %c0_6, %c0_7, %c0_8], %10 {strides = array<i32>} : memref<1x3x8x128xf32, #tpu.memory_space<vmem>>, vector<1x1x8x128xf32>,
    %c0_9 = arith.constant 0 : index
    %c1 = arith.constant 1 : index
    %c0_10 = arith.constant 0 : index
    %c0_11 = arith.constant 0 : index
    %11 = vector.load %arg4[%c0_9, %c1, %c0_10, %c0_11] : memref<1x3x8x128xf32, #tpu.memory_space<vmem>>, vector<1x1x8x128xf32>
    %12 = vector.shape_cast %11 : vector<1x1x8x128xf32> to vector<8x128xf32>
    %c1_12 = arith.constant 1 : index
    %13 = memref.load %arg2[%c1_12] : memref<3xf32, #tpu.memory_space<smem>>
    %14 = vector.broadcast %13 : f32 to vector<8x128xf32>
    %15 = arith.subf %12, %14 : vector<8x128xf32>
    %c1_13 = arith.constant 1 : index
    %16 = memref.load %arg3[%c1_13] : memref<3xf32, #tpu.memory_space<smem>>
    %17 = vector.broadcast %16 : f32 to vector<8x128xf32>
    %18 = arith.mulf %15, %17 : vector<8x128xf32>
    %c0_14 = arith.constant 0 : index
    %c1_15 = arith.constant 1 : index
    %c0_16 = arith.constant 0 : index
    %c0_17 = arith.constant 0 : index
    %19 = vector.load %arg5[%c0_14, %c1_15, %c0_16, %c0_17] : memref<1x3x8x128xf32, #tpu.memory_space<vmem>>, vector<1x1x8x128xf32>
    %20 = vector.shape_cast %19 : vector<1x1x8x128xf32> to vector<8x128xf32>
    %21 = vector.shape_cast %18 : vector<8x128xf32> to vector<1x1x8x128xf32>
    tpu.vector_store %arg5[%c0_14, %c1_15, %c0_16, %c0_17], %21 {strides = array<i32>} : memref<1x3x8x128xf32, #tpu.memory_space<vmem>>, vector<1x1x8x128xf32>,
    %c0_18 = arith.constant 0 : index
    %c2 = arith.constant 2 : index
    %c0_19 = arith.constant 0 : index
    %c0_20 = arith.constant 0 : index
    %22 = vector.load %arg4[%c0_18, %c2, %c0_19, %c0_20] : memref<1x3x8x128xf32, #tpu.memory_space<vmem>>, vector<1x1x8x128xf32>
    %23 = vector.shape_cast %22 : vector<1x1x8x128xf32> to vector<8x128xf32>
    %c2_21 = arith.constant 2 : index
    %24 = memref.load %arg2[%c2_21] : memref<3xf32, #tpu.memory_space<smem>>
    %25 = vector.broadcast %24 : f32 to vector<8x128xf32>
    %26 = arith.subf %23, %25 : vector<8x128xf32>
    %c2_22 = arith.constant 2 : index
    %27 = memref.load %arg3[%c2_22] : memref<3xf32, #tpu.memory_space<smem>>
    %28 = vector.broadcast %27 : f32 to vector<8x128xf32>
    %29 = arith.mulf %26, %28 : vector<8x128xf32>
    %c0_23 = arith.constant 0 : index
    %c2_24 = arith.constant 2 : index
    %c0_25 = arith.constant 0 : index
    %c0_26 = arith.constant 0 : index
    %30 = vector.load %arg5[%c0_23, %c2_24, %c0_25, %c0_26] : memref<1x3x8x128xf32, #tpu.memory_space<vmem>>, vector<1x1x8x128xf32>
    %31 = vector.shape_cast %30 : vector<1x1x8x128xf32> to vector<8x128xf32>
    %32 = vector.shape_cast %29 : vector<8x128xf32> to vector<1x1x8x128xf32>
    tpu.vector_store %arg5[%c0_23, %c2_24, %c0_25, %c0_26], %32 {strides = array<i32>} : memref<1x3x8x128xf32, #tpu.memory_space<vmem>>, vector<1x1x8x128xf32>,
    return
  }
  func.func @transform_0(%arg0: i32, %arg1: i32) -> i32 {
    %c0_i32 = arith.constant 0 : i32
    %c0_i32_0 = arith.constant 0 : i32
    return %c0_i32 : i32
  }
  func.func @transform_1(%arg0: i32, %arg1: i32) -> i32 {
    %c0_i32 = arith.constant 0 : i32
    %c0_i32_0 = arith.constant 0 : i32
    return %c0_i32 : i32
  }
  func.func @transform_2(%arg0: i32, %arg1: i32) -> (i32, i32, i32, i32) {
    %c0_i32 = arith.constant 0 : i32
    %c0_i32_0 = arith.constant 0 : i32
    %c0_i32_1 = arith.constant 0 : i32
    return %arg0, %c0_i32, %arg1, %c0_i32_0 : i32, i32, i32, i32
  }
  func.func @transform_3(%arg0: i32, %arg1: i32) -> (i32, i32, i32, i32) {
    %c0_i32 = arith.constant 0 : i32
    %c0_i32_0 = arith.constant 0 : i32
    %c0_i32_1 = arith.constant 0 : i32
    return %arg0, %c0_i32, %arg1, %c0_i32_0 : i32, i32, i32, i32
  }
}

</mosaic_0001>

<bundles_post_ra>
// kernel: normalize.1
= control target key start
LH: loop header
LB: loop body
LE: loop exit
PB: predicated region body
PF: predicated region fallthrough
CT: control target
= control target key end

     0   :  { %8 = vsyncpa [#allocation3], 0  ;;  %s590_s0 = inlined_call_operand.vmem [shape: f32[3], index: 0, kind: input, shape index: {}]   ;;  %s591_s1 = inlined_call_operand.vmem [shape: f32[3], index: 1, kind: input, shape index: {}]   ;;  %s592_s2 = inlined_call_operand.vmem [shape: f32[2,3,8,128], index: 2, kind: input, shape index: {}]   ;;  %s593_s3 = inlined_call_operand.vmem [shape: f32[2,3,8,128], index: 3, kind: output, shape index: {}]  }
   0x1   :  { %9 = vsyncpa [#allocation5], 0  ;;  %s514_s12 = smov 0   ;;  %s516_s13 = smov 0  }
   0x2   :  { %s518_s14 = smov 0  }
   0x3 LB: > { %s363_s15 = sadd.s32 4294967295, %s490_s14   ;;  %s27_s16 = sadd.s32 1, %s486_s13  ;;  %s490_s14 = sphi %s518_s14, %s15_s14   ;;  %s486_s13 = sphi %s516_s13, %s603_s13   ;;  %s482_s12 = sphi %s514_s12, %s602_s12  }
   0x4   : > { %p29_p0 = scmp.ge.s32.totalorder %s27_s16, 2  ;;  %p365_p1 = scmp.ge.s32.totalorder %s490_s14, 1 }
   0x5   : > { %p130_p2 = scmp.lt.s32.totalorder %s490_s14, 3  ;;  %p539_p4 = scmp.eq.s32.totalorder %s363_s15, 0 }
   0x6   : > { %s605_s16 = smov (%p29_p0, %s27_s16), 0  ;;  %s143_s21 = sshll.u32 %s590_s0, 4  ;;  %s144_s21 = int_to_ptr.vmem [resolvable:$true] %s143_s21 }
   0x7   : > { %p535_p3 = pnand %p365_p1, %p130_p2  ;;  %s154_s24 = sshll.u32 %s591_s1, 4  ;;  %s155_s24 = int_to_ptr.vmem [resolvable:$true] %s154_s24 }
   0x8   : > { %s598_s18 = scalar_select %p539_p4, 1, 0 }
   0x9   : > { %s597_s17 = scalar_select %p535_p3, 1, 0 }
   0xa   : > { %p393_p5 = pneg %p535_p3  ;;  %s430_s26 = scalar_lea.vmem %s144_s21, 16 }
   0xb   : > { %p431_p7 = scmp.ne.s32.totalorder %s144_s21, %s430_s26  ;;  %p438_p11 = scmp.lt.s32.totalorder %s144_s21, %s144_s21 }
   0xc   : > { %p553_p6 = pnand %p539_p4, %p393_p5  ;;  %p439_p12 = scmp.lt.s32.totalorder %s430_s26, %s430_s26 }
   0xe   : > { %p432_p8 = pneg %p553_p6  ;;  %p440_p13 = por %p439_p12, %p438_p11 }
  0x10   : > { %p433_p9 = pnand %p432_p8, %p431_p7 }
  0x12   : > { %p434_p10 = pneg %p433_p9 }
  0x14   : > { %p441_p0 = pnand %p440_p13, %p434_p10 }
  0x16   : > { %444 = shalt.err (!%p441_p0)
}
  0x17   : > { %s492_s27 = smov [#allocation2]   ;;  %s445_s28 = scalar_lea.vmem %s155_s24, 16 }
  0x18   : > { %396 = dma.vmem_to_smem (!%p553_p6), %s144_s21, 16, %s492_s27, [#allocation3]  }
  0x19   : > { %p446_p1 = scmp.ne.s32.totalorder %s155_s24, %s445_s28  ;;  %p453_p4 = scmp.lt.s32.totalorder %s155_s24, %s155_s24 }
  0x1a   : > { %p454_p3 = scmp.lt.s32.totalorder %s445_s28, %s445_s28 }
  0x1b   : > { %p448_p2 = pnand %p446_p1, %p432_p8 }
  0x1c   : > { %p455_p7 = por %p454_p3, %p453_p4 }
  0x1d   : > { %p449_p5 = pneg %p448_p2 }
  0x1f   : > { %p456_p9 = pnand %p455_p7, %p449_p5 }
  0x21   : > { %459 = shalt.err (!%p456_p9)
}
  0x22   : > { %s493_s29 = smov [#allocation4]   ;;  %p600_p10 = scmp.ne.s32.totalorder %s597_s17, 0 }
  0x23   : > { %399 = dma.vmem_to_smem (!%p553_p6), %s155_s24, 16, %s493_s29, [#allocation5]  }
  0x24   : > { %178 = sbr.rel (%p600_p10) target bundleno = 63 (0x3f), region = 32  ;;  %p601_p11 = scmp.ne.s32.totalorder (!%p600_p10), %s598_s18, 0 }
  0x2b   : > { %473 = dma.done.wait (%p601_p11), [#allocation3], 16  }
  0x2c   : > { %475 = vsyncadd (%p601_p11), [#allocation3], 4294967280 }
  0x2d   : > { %477 = dma.done.wait (%p601_p11), [#allocation5], 16  }
  0x2e   : > { %479 = vsyncadd (%p601_p11), [#allocation5], 4294967280 }
  0x2f   : > { %188 = sfence }
  0x30   : > { %p213_p3 = scmp.lt.s32.totalorder %s482_s12, 1  ;;  %s230_s30 = sld [smem:[#allocation2]] }
  0x31   : > { %s233_s4 = sld [smem:[#allocation4]]  ;;  %s375_s5 = sld [smem:[#allocation2 + $0x1]] }
  0x32   : > { %s607_s12 = smov (!%p213_p3, %s482_s12), 1  ;;  %s376_s6 = sld [smem:[#allocation4 + $0x1]] }
  0x33   : > { %s379_s7 = sld [smem:[#allocation2 + $0x2]]  ;;  %s384_s8 = smul.u32 24, %s607_s12 }
  0x34   : > { %s380_s9 = sld [smem:[#allocation4 + $0x2]] }
  0x35   : > { %s220_s15 = scalar_lea.vmem %s592_s2, %s384_s8  ;;  %s228_s19 = scalar_lea.vmem %s593_s3, %s384_s8 }
  0x36   : > { %v231_v0 = vstv %s230_s30  ;;  %v229_v1 = vld [vmem:[%s220_s15] sm:$0xff]  ;;  %v374_v3 = vld [vmem:[%s220_s15 + $0x8] sm:$0xff]  ;;  %v378_v7 = vld [vmem:[%s220_s15 + $0x10] sm:$0xff] }
  0x37   : > { %v234_v2 = vstv %s233_s4  ;;  %v240_v4 = vstv %s375_s5  ;;  %v232_v5 = vsub.f32 %v229_v1, %v231_v0 }
  0x38   : > { %v241_v6 = vsub.f32 %v374_v3, %v240_v4  ;;  %v243_v8 = vstv %s376_s6 }
  0x39   : > { %v250_v9 = vstv %s379_s7  ;;  %v235_v10 = vmul.f32 %v234_v2, %v232_v5 }
  0x3a   : > { %v244_v11 = vmul.f32 %v243_v8, %v241_v6  ;;  %v251_v12 = vsub.f32 %v378_v7, %v250_v9  ;;  %v253_v13 = vstv %s380_s9 }
  0x3b   : > { %236 = vst [vmem:[%s228_s19] sm:$0xff] %v235_v10 }
  0x3c   : > { %377 = vst [vmem:[%s228_s19 + $0x8] sm:$0xff] %v244_v11  ;;  %v254_v14 = vmul.f32 %v253_v13, %v251_v12 }
  0x3e   : > { %381 = vst [vmem:[%s228_s19 + $0x10] sm:$0xff] %v254_v14 }
  0x3f PF: > { %s15_s14 = sadd.s32 1, %s490_s14   ;;  %s602_s12 = smov %s486_s13 }
  0x40   : > { %p12_p4 = scmp.ge.s32.totalorder %s15_s14, 4   ;;  %s603_s13 = smov %s605_s16 }
  0x42   :  { %14 = sbr.rel (!%p12_p4) target bundleno = 3 (0x3), region = 75 }
  0x49   :  { %284 = vsyncpa [#allocation3], 1 }
  0x4a   :  { %286 = vsyncpa [#allocation3 + $0x1], 1 }
  0x4b   :  { %287 = vsyncpa [#allocation5], 1 }

</bundles_post_ra>
